<compile_context>
chip_gen: v7x
topology: tpu7x:2x2x1
jax: 0.10.0
libtpu: 0.0.40
codegen_flags: <defaults>
</compile_context>

<pallas_src>
import jax
import jax.numpy as jnp
from jax.experimental import pallas as pl
from jax.experimental.pallas import tpu as pltpu

# ---- model sizes (small, consistent with a seq2seq encoder + MLP head) ----
VOCAB = 16
EMBED = 32
HIDDEN = 32
MLP_HIDDEN = 32
N_CLASSES = 4
BATCH = 2
SEQ = 8

BATCH_PAD = 8          # pad batch to sublane width: aligned per-step slices, unmasked store
OUT_PAD = 128          # lane-dense output width; sliced back to N_CLASSES in the wrapper

# packed parameter slab layout (ROWS x 128 lanes, f32) -- all pieces 8-sublane aligned
ROW_EMBWI = 0          # rows   0..15 : emb @ W_ih^T + (bi + [bh_r, bh_z, 0])   (16 x 96)
ROW_WH = 16            # rows  16..47 : lanes 0..95 = W_hh^T, lanes 96..127 = W1 (32 x 128)
ROW_W2 = 48            # rows  48..79 : W2 zero-padded to 128 lanes               (32 x 128)
ROW_BHN = 80           # rows  80..87 : bh_n broadcast to 8 sublanes              ( 8 x 32)
ROW_B1 = 88            # rows  88..95 : b1   broadcast to 8 sublanes              ( 8 x 32)
ROW_B2 = 96            # rows  96..103: b2   broadcast to 8 sublanes (128-padded) ( 8 x 128)
ROWS = 104


# ------------------------- fused forward kernel ------------------------------
def fused_kernel(tok_ref, p_ref, out_ref):
    f32 = jnp.float32
    V, H, MH = VOCAB, HIDDEN, MLP_HIDDEN
    B = out_ref.shape[0]              # padded batch (8)
    TB = tok_ref.shape[0]
    T = TB // B

    # ---- unpack the single parameter slab (static, 8-aligned sublane slices) ----
    emb_wi = p_ref[ROW_EMBWI:ROW_EMBWI + V, :]       # (16, 128): per-token W_ih x + folded biases
    wh_w1 = p_ref[ROW_WH:ROW_WH + H, :]              # (32, 128): [W_hh^T | W1]
    w2p = p_ref[ROW_W2:ROW_W2 + MH, :]               # (32, 128)
    bhn = p_ref[ROW_BHN:ROW_BHN + B, 0:H]            # (8, 32)  pre-broadcast bh_n
    b1 = p_ref[ROW_B1:ROW_B1 + B, 0:MH]              # (8, 32)  pre-broadcast b1
    b2p = p_ref[ROW_B2:ROW_B2 + B, :]                # (8, 128) pre-broadcast b2 (lane padded)
    w1 = wh_w1[:, 3 * H:3 * H + MH]                  # (32, 32) sliced once, outside the loop

    # ---- embedding gather + input-gate projections for ALL timesteps: one MXU matmul ----
    tok = tok_ref[...]                                               # (T*B, 1) int32, time-major
    lanes = jax.lax.broadcasted_iota(jnp.int32, (TB, V), 1)
    one_hot = jnp.where(tok == lanes, 1.0, 0.0).astype(f32)          # (T*B, 16)
    gi_all = jnp.dot(one_hot, emb_wi, preferred_element_type=f32)    # (T*B, 128); lanes 0..95 valid

    # ---- GRU recurrence, fully unrolled; ONE (8,32)x(32,128) hidden matmul per step ----
    h = jnp.zeros((B, H), f32)
    for t in range(T):
        gi = gi_all[t * B:(t + 1) * B, :]                            # (8, 128), aligned slice
        gh = jnp.dot(h, wh_w1, preferred_element_type=f32)           # (8, 128); lanes 0..95 = W_hh h
        rz = jax.nn.sigmoid(gi[:, 0:2 * H] + gh[:, 0:2 * H])
        r = rz[:, 0:H]
        z = rz[:, H:2 * H]
        n = jnp.tanh(gi[:, 2 * H:3 * H] + r * (gh[:, 2 * H:3 * H] + bhn))
        h = (1.0 - z) * n + z * h

    # ---- MLP head: Linear -> ReLU -> Linear (lane-dense padded output, unmasked store) ----
    a = jnp.maximum(jnp.dot(h, w1, preferred_element_type=f32) + b1, 0.0)
    out_ref[...] = jnp.dot(a, w2p, preferred_element_type=f32) + b2p


# ------------------- one-time parameter packing / constant folding -------------------
def prepare_params(params):
    """Fold & pack the 9 parameter arrays into a single lane-dense (ROWS,128) f32 slab."""
    emb, wi, wh, bi, bh, w1, b1, w2, b2 = params
    H = HIDDEN
    # bi + bh_r + bh_z fold into the per-token table; bh_n must stay inside r*(...) -> kept separate
    bias_fold = bi[0] + jnp.concatenate([bh[0, :2 * H], jnp.zeros((H,), jnp.float32)])
    emb_wi = emb @ wi + bias_fold[None, :]                            # (VOCAB, 3H)

    slab = jnp.zeros((ROWS, 128), jnp.float32)
    slab = slab.at[ROW_EMBWI:ROW_EMBWI + VOCAB, 0:3 * H].set(emb_wi)
    slab = slab.at[ROW_WH:ROW_WH + H, 0:3 * H].set(wh)
    slab = slab.at[ROW_WH:ROW_WH + H, 3 * H:3 * H + MLP_HIDDEN].set(w1)
    slab = slab.at[ROW_W2:ROW_W2 + MLP_HIDDEN, 0:N_CLASSES].set(w2)
    slab = slab.at[ROW_BHN:ROW_BHN + BATCH_PAD, 0:H].set(
        jnp.broadcast_to(bh[0, 2 * H:3 * H], (BATCH_PAD, H)))
    slab = slab.at[ROW_B1:ROW_B1 + BATCH_PAD, 0:MLP_HIDDEN].set(
        jnp.broadcast_to(b1[0], (BATCH_PAD, MLP_HIDDEN)))
    slab = slab.at[ROW_B2:ROW_B2 + BATCH_PAD, 0:N_CLASSES].set(
        jnp.broadcast_to(b2[0], (BATCH_PAD, N_CLASSES)))
    return slab


# --------------------------- full forward (wrapper) ---------------------------
@jax.jit
def discriminative_forward(tokens, slab):
    B, T = tokens.shape
    # pad batch to the sublane width and flatten time-major: row index = t*BATCH_PAD + b
    tok_pad = jnp.zeros((BATCH_PAD, T), jnp.int32).at[:B, :].set(tokens.astype(jnp.int32))
    tok_tm = tok_pad.T.reshape(T * BATCH_PAD, 1)

    logits_padded = pl.pallas_call(
        fused_kernel,
        out_shape=jax.ShapeDtypeStruct((BATCH_PAD, OUT_PAD), jnp.float32),
        in_specs=[pl.BlockSpec(memory_space=pltpu.MemorySpace.VMEM),
                  pl.BlockSpec(memory_space=pltpu.MemorySpace.VMEM)],
        out_specs=pl.BlockSpec(memory_space=pltpu.MemorySpace.VMEM),
    )(tok_tm, slab)
    return logits_padded[:B, :N_CLASSES]


# ------------------------------ pure-JAX reference ----------------------------
def reference_forward(tokens, params):
    emb, wi, wh, bi, bh, w1, b1, w2, b2 = params
    x = jnp.take(emb, tokens, axis=0)            # (B, T, E)
    x = jnp.transpose(x, (1, 0, 2))              # (T, B, E)
    h = jnp.zeros((tokens.shape[0], HIDDEN), jnp.float32)
    H = HIDDEN
    for t in range(x.shape[0]):
        gi = x[t] @ wi + bi[0]
        gh = h @ wh + bh[0]
        r = jax.nn.sigmoid(gi[:, :H] + gh[:, :H])
        z = jax.nn.sigmoid(gi[:, H:2 * H] + gh[:, H:2 * H])
        n = jnp.tanh(gi[:, 2 * H:] + r * gh[:, 2 * H:])
        h = (1.0 - z) * n + z * h
    a = jnp.maximum(h @ w1 + b1[0], 0.0)
    return a @ w2 + b2[0]


def make_params(key):
    ks = jax.random.split(key, 9)
    s = 0.1
    emb = s * jax.random.normal(ks[0], (VOCAB, EMBED), jnp.float32)
    wi = s * jax.random.normal(ks[1], (EMBED, 3 * HIDDEN), jnp.float32)    # W_ih^T
    wh = s * jax.random.normal(ks[2], (HIDDEN, 3 * HIDDEN), jnp.float32)   # W_hh^T
    bi = s * jax.random.normal(ks[3], (1, 3 * HIDDEN), jnp.float32)
    bh = s * jax.random.normal(ks[4], (1, 3 * HIDDEN), jnp.float32)
    w1 = s * jax.random.normal(ks[5], (HIDDEN, MLP_HIDDEN), jnp.float32)
    b1 = s * jax.random.normal(ks[6], (1, MLP_HIDDEN), jnp.float32)
    w2 = s * jax.random.normal(ks[7], (MLP_HIDDEN, N_CLASSES), jnp.float32)
    b2 = s * jax.random.normal(ks[8], (1, N_CLASSES), jnp.float32)
    return (emb, wi, wh, bi, bh, w1, b1, w2, b2)


if __name__ == "__main__":
    key = jax.random.PRNGKey(0)
    k_tok, k_par = jax.random.split(key)
    tokens = jax.random.randint(k_tok, (BATCH, SEQ), 0, VOCAB, dtype=jnp.int32)
    params = make_params(k_par)
    slab = prepare_params(params)        # one-time packing/folding (not per forward call)

    out = discriminative_forward(tokens, slab)
    out = jax.block_until_ready(out)

    ref = reference_forward(tokens, params)
    assert out.shape == (BATCH, N_CLASSES)
    assert jnp.allclose(out, ref, atol=2e-3, rtol=2e-3)
    print("KERNEL_OK")
</pallas_src>

<mosaic_0001>
module attributes {stable_mosaic.version = 11 : i64} {
  func.func @fused_kernel(%arg0: memref<64x1xi32, #tpu.memory_space<vmem>>, %arg1: memref<104x128xf32, #tpu.memory_space<vmem>>, %arg2: memref<8x128xf32, #tpu.memory_space<vmem>>) attributes {dimension_semantics = [], scalar_prefetch = 0 : i64, scratch_operands = 0 : i64, tpu.core_type = #tpu.core_type<tc>} {
    %c0 = arith.constant 0 : index
    %c0_0 = arith.constant 0 : index
    %0 = vector.load %arg1[%c0, %c0_0] : memref<104x128xf32, #tpu.memory_space<vmem>>, vector<16x128xf32>
    %c16 = arith.constant 16 : index
    %c0_1 = arith.constant 0 : index
    %1 = vector.load %arg1[%c16, %c0_1] : memref<104x128xf32, #tpu.memory_space<vmem>>, vector<32x128xf32>
    %c48 = arith.constant 48 : index
    %c0_2 = arith.constant 0 : index
    %2 = vector.load %arg1[%c48, %c0_2] : memref<104x128xf32, #tpu.memory_space<vmem>>, vector<32x128xf32>
    %c80 = arith.constant 80 : index
    %c0_3 = arith.constant 0 : index
    %3 = vector.load %arg1[%c80, %c0_3] : memref<104x128xf32, #tpu.memory_space<vmem>>, vector<8x32xf32>
    %c88 = arith.constant 88 : index
    %c0_4 = arith.constant 0 : index
    %4 = vector.load %arg1[%c88, %c0_4] : memref<104x128xf32, #tpu.memory_space<vmem>>, vector<8x32xf32>
    %c96 = arith.constant 96 : index
    %c0_5 = arith.constant 0 : index
    %5 = vector.load %arg1[%c96, %c0_5] : memref<104x128xf32, #tpu.memory_space<vmem>>, vector<8x128xf32>
    %6 = vector.extract_strided_slice %1 {offsets = [0, 96], sizes = [32, 32], strides = [1, 1]} : vector<32x128xf32> to vector<32x32xf32>
    %c0_6 = arith.constant 0 : index
    %c0_7 = arith.constant 0 : index
    %7 = vector.load %arg0[%c0_6, %c0_7] : memref<64x1xi32, #tpu.memory_space<vmem>>, vector<64x1xi32>
    %8 = tpu.iota {dimensions = array<i32: 1>} : vector<64x16xi32>
    %9 = vector.broadcast %7 : vector<64x1xi32> to vector<64x16xi32>
    %10 = arith.cmpi eq, %9, %8 : vector<64x16xi32>
    %cst = arith.constant 1.000000e+00 : f32
    %cst_8 = arith.constant 0.000000e+00 : f32
    %11 = vector.broadcast %cst : f32 to vector<64x16xf32>
    %12 = vector.broadcast %cst_8 : f32 to vector<64x16xf32>
    %13 = arith.select %10, %11, %12 : vector<64x16xi1>, vector<64x16xf32>
    %cst_9 = arith.constant dense<0.000000e+00> : vector<64x128xf32>
    %14 = tpu.matmul %13, %0, %cst_9 {dimension_numbers = #tpu.dot_dimension_numbers<[1], [0], [0], [1], [0, 0, 1, 1], [], []>} : vector<64x16xf32>, vector<16x128xf32>, vector<64x128xf32> -> vector<64x128xf32>
    %cst_10 = arith.constant 0.000000e+00 : f32
    %15 = vector.broadcast %cst_10 : f32 to vector<8x32xf32>
    %16 = vector.extract_strided_slice %14 {offsets = [0, 0], sizes = [8, 128], strides = [1, 1]} : vector<64x128xf32> to vector<8x128xf32>
    %cst_11 = arith.constant dense<0.000000e+00> : vector<8x128xf32>
    %17 = tpu.matmul %15, %1, %cst_11 {dimension_numbers = #tpu.dot_dimension_numbers<[1], [0], [0], [1], [0, 0, 1, 1], [], []>} : vector<8x32xf32>, vector<32x128xf32>, vector<8x128xf32> -> vector<8x128xf32>
    %18 = vector.extract_strided_slice %16 {offsets = [0, 0], sizes = [8, 64], strides = [1, 1]} : vector<8x128xf32> to vector<8x64xf32>
    %19 = vector.extract_strided_slice %17 {offsets = [0, 0], sizes = [8, 64], strides = [1, 1]} : vector<8x128xf32> to vector<8x64xf32>
    %20 = arith.addf %18, %19 : vector<8x64xf32>
    %21 = arith.negf %20 : vector<8x64xf32>
    %22 = math.exp %21 : vector<8x64xf32>
    %cst_12 = arith.constant 1.000000e+00 : f32
    %23 = vector.broadcast %cst_12 : f32 to vector<8x64xf32>
    %24 = arith.addf %23, %22 : vector<8x64xf32>
    %25 = arith.divf %23, %24 : vector<8x64xf32>
    %26 = vector.extract_strided_slice %25 {offsets = [0, 0], sizes = [8, 32], strides = [1, 1]} : vector<8x64xf32> to vector<8x32xf32>
    %27 = vector.extract_strided_slice %25 {offsets = [0, 32], sizes = [8, 32], strides = [1, 1]} : vector<8x64xf32> to vector<8x32xf32>
    %28 = vector.extract_strided_slice %16 {offsets = [0, 64], sizes = [8, 32], strides = [1, 1]} : vector<8x128xf32> to vector<8x32xf32>
    %29 = vector.extract_strided_slice %17 {offsets = [0, 64], sizes = [8, 32], strides = [1, 1]} : vector<8x128xf32> to vector<8x32xf32>
    %30 = arith.addf %29, %3 : vector<8x32xf32>
    %31 = arith.mulf %26, %30 : vector<8x32xf32>
    %32 = arith.addf %28, %31 : vector<8x32xf32>
    %33 = math.tanh %32 : vector<8x32xf32>
    %cst_13 = arith.constant 1.000000e+00 : f32
    %34 = vector.broadcast %cst_13 : f32 to vector<8x32xf32>
    %35 = arith.subf %34, %27 : vector<8x32xf32>
    %36 = arith.mulf %35, %33 : vector<8x32xf32>
    %37 = arith.mulf %27, %15 : vector<8x32xf32>
    %38 = arith.addf %36, %37 : vector<8x32xf32>
    %39 = vector.extract_strided_slice %14 {offsets = [8, 0], sizes = [8, 128], strides = [1, 1]} : vector<64x128xf32> to vector<8x128xf32>
    %cst_14 = arith.constant dense<0.000000e+00> : vector<8x128xf32>
    %40 = tpu.matmul %38, %1, %cst_14 {dimension_numbers = #tpu.dot_dimension_numbers<[1], [0], [0], [1], [0, 0, 1, 1], [], []>} : vector<8x32xf32>, vector<32x128xf32>, vector<8x128xf32> -> vector<8x128xf32>
    %41 = vector.extract_strided_slice %39 {offsets = [0, 0], sizes = [8, 64], strides = [1, 1]} : vector<8x128xf32> to vector<8x64xf32>
    %42 = vector.extract_strided_slice %40 {offsets = [0, 0], sizes = [8, 64], strides = [1, 1]} : vector<8x128xf32> to vector<8x64xf32>
    %43 = arith.addf %41, %42 : vector<8x64xf32>
    %44 = arith.negf %43 : vector<8x64xf32>
    %45 = math.exp %44 : vector<8x64xf32>
    %cst_15 = arith.constant 1.000000e+00 : f32
    %46 = vector.broadcast %cst_15 : f32 to vector<8x64xf32>
    %47 = arith.addf %46, %45 : vector<8x64xf32>
    %48 = arith.divf %46, %47 : vector<8x64xf32>
    %49 = vector.extract_strided_slice %48 {offsets = [0, 0], sizes = [8, 32], strides = [1, 1]} : vector<8x64xf32> to vector<8x32xf32>
    %50 = vector.extract_strided_slice %48 {offsets = [0, 32], sizes = [8, 32], strides = [1, 1]} : vector<8x64xf32> to vector<8x32xf32>
    %51 = vector.extract_strided_slice %39 {offsets = [0, 64], sizes = [8, 32], strides = [1, 1]} : vector<8x128xf32> to vector<8x32xf32>
    %52 = vector.extract_strided_slice %40 {offsets = [0, 64], sizes = [8, 32], strides = [1, 1]} : vector<8x128xf32> to vector<8x32xf32>
    %53 = arith.addf %52, %3 : vector<8x32xf32>
    %54 = arith.mulf %49, %53 : vector<8x32xf32>
    %55 = arith.addf %51, %54 : vector<8x32xf32>
    %56 = math.tanh %55 : vector<8x32xf32>
    %cst_16 = arith.constant 1.000000e+00 : f32
    %57 = vector.broadcast %cst_16 : f32 to vector<8x32xf32>
    %58 = arith.subf %57, %50 : vector<8x32xf32>
    %59 = arith.mulf %58, %56 : vector<8x32xf32>
    %60 = arith.mulf %50, %38 : vector<8x32xf32>
    %61 = arith.addf %59, %60 : vector<8x32xf32>
    %62 = vector.extract_strided_slice %14 {offsets = [16, 0], sizes = [8, 128], strides = [1, 1]} : vector<64x128xf32> to vector<8x128xf32>
    %cst_17 = arith.constant dense<0.000000e+00> : vector<8x128xf32>
    %63 = tpu.matmul %61, %1, %cst_17 {dimension_numbers = #tpu.dot_dimension_numbers<[1], [0], [0], [1], [0, 0, 1, 1], [], []>} : vector<8x32xf32>, vector<32x128xf32>, vector<8x128xf32> -> vector<8x128xf32>
    %64 = vector.extract_strided_slice %62 {offsets = [0, 0], sizes = [8, 64], strides = [1, 1]} : vector<8x128xf32> to vector<8x64xf32>
    %65 = vector.extract_strided_slice %63 {offsets = [0, 0], sizes = [8, 64], strides = [1, 1]} : vector<8x128xf32> to vector<8x64xf32>
    %66 = arith.addf %64, %65 : vector<8x64xf32>
    %67 = arith.negf %66 : vector<8x64xf32>
    %68 = math.exp %67 : vector<8x64xf32>
    %cst_18 = arith.constant 1.000000e+00 : f32
    %69 = vector.broadcast %cst_18 : f32 to vector<8x64xf32>
    %70 = arith.addf %69, %68 : vector<8x64xf32>
    %71 = arith.divf %69, %70 : vector<8x64xf32>
    %72 = vector.extract_strided_slice %71 {offsets = [0, 0], sizes = [8, 32], strides = [1, 1]} : vector<8x64xf32> to vector<8x32xf32>
    %73 = vector.extract_strided_slice %71 {offsets = [0, 32], sizes = [8, 32], strides = [1, 1]} : vector<8x64xf32> to vector<8x32xf32>
    %74 = vector.extract_strided_slice %62 {offsets = [0, 64], sizes = [8, 32], strides = [1, 1]} : vector<8x128xf32> to vector<8x32xf32>
    %75 = vector.extract_strided_slice %63 {offsets = [0, 64], sizes = [8, 32], strides = [1, 1]} : vector<8x128xf32> to vector<8x32xf32>
    %76 = arith.addf %75, %3 : vector<8x32xf32>
    %77 = arith.mulf %72, %76 : vector<8x32xf32>
    %78 = arith.addf %74, %77 : vector<8x32xf32>
    %79 = math.tanh %78 : vector<8x32xf32>
    %cst_19 = arith.constant 1.000000e+00 : f32
    %80 = vector.broadcast %cst_19 : f32 to vector<8x32xf32>
    %81 = arith.subf %80, %73 : vector<8x32xf32>
    %82 = arith.mulf %81, %79 : vector<8x32xf32>
    %83 = arith.mulf %73, %61 : vector<8x32xf32>
    %84 = arith.addf %82, %83 : vector<8x32xf32>
    %85 = vector.extract_strided_slice %14 {offsets = [24, 0], sizes = [8, 128], strides = [1, 1]} : vector<64x128xf32> to vector<8x128xf32>
    %cst_20 = arith.constant dense<0.000000e+00> : vector<8x128xf32>
    %86 = tpu.matmul %84, %1, %cst_20 {dimension_numbers = #tpu.dot_dimension_numbers<[1], [0], [0], [1], [0, 0, 1, 1], [], []>} : vector<8x32xf32>, vector<32x128xf32>, vector<8x128xf32> -> vector<8x128xf32>
    %87 = vector.extract_strided_slice %85 {offsets = [0, 0], sizes = [8, 64], strides = [1, 1]} : vector<8x128xf32> to vector<8x64xf32>
    %88 = vector.extract_strided_slice %86 {offsets = [0, 0], sizes = [8, 64], strides = [1, 1]} : vector<8x128xf32> to vector<8x64xf32>
    %89 = arith.addf %87, %88 : vector<8x64xf32>
    %90 = arith.negf %89 : vector<8x64xf32>
    %91 = math.exp %90 : vector<8x64xf32>
    %cst_21 = arith.constant 1.000000e+00 : f32
    %92 = vector.broadcast %cst_21 : f32 to vector<8x64xf32>
    %93 = arith.addf %92, %91 : vector<8x64xf32>
    %94 = arith.divf %92, %93 : vector<8x64xf32>
    %95 = vector.extract_strided_slice %94 {offsets = [0, 0], sizes = [8, 32], strides = [1, 1]} : vector<8x64xf32> to vector<8x32xf32>
    %96 = vector.extract_strided_slice %94 {offsets = [0, 32], sizes = [8, 32], strides = [1, 1]} : vector<8x64xf32> to vector<8x32xf32>
    %97 = vector.extract_strided_slice %85 {offsets = [0, 64], sizes = [8, 32], strides = [1, 1]} : vector<8x128xf32> to vector<8x32xf32>
    %98 = vector.extract_strided_slice %86 {offsets = [0, 64], sizes = [8, 32], strides = [1, 1]} : vector<8x128xf32> to vector<8x32xf32>
    %99 = arith.addf %98, %3 : vector<8x32xf32>
    %100 = arith.mulf %95, %99 : vector<8x32xf32>
    %101 = arith.addf %97, %100 : vector<8x32xf32>
    %102 = math.tanh %101 : vector<8x32xf32>
    %cst_22 = arith.constant 1.000000e+00 : f32
    %103 = vector.broadcast %cst_22 : f32 to vector<8x32xf32>
    %104 = arith.subf %103, %96 : vector<8x32xf32>
    %105 = arith.mulf %104, %102 : vector<8x32xf32>
    %106 = arith.mulf %96, %84 : vector<8x32xf32>
    %107 = arith.addf %105, %106 : vector<8x32xf32>
    %108 = vector.extract_strided_slice %14 {offsets = [32, 0], sizes = [8, 128], strides = [1, 1]} : vector<64x128xf32> to vector<8x128xf32>
    %cst_23 = arith.constant dense<0.000000e+00> : vector<8x128xf32>
    %109 = tpu.matmul %107, %1, %cst_23 {dimension_numbers = #tpu.dot_dimension_numbers<[1], [0], [0], [1], [0, 0, 1, 1], [], []>} : vector<8x32xf32>, vector<32x128xf32>, vector<8x128xf32> -> vector<8x128xf32>
    %110 = vector.extract_strided_slice %108 {offsets = [0, 0], sizes = [8, 64], strides = [1, 1]} : vector<8x128xf32> to vector<8x64xf32>
    %111 = vector.extract_strided_slice %109 {offsets = [0, 0], sizes = [8, 64], strides = [1, 1]} : vector<8x128xf32> to vector<8x64xf32>
    %112 = arith.addf %110, %111 : vector<8x64xf32>
    %113 = arith.negf %112 : vector<8x64xf32>
    %114 = math.exp %113 : vector<8x64xf32>
    %cst_24 = arith.constant 1.000000e+00 : f32
    %115 = vector.broadcast %cst_24 : f32 to vector<8x64xf32>
    %116 = arith.addf %115, %114 : vector<8x64xf32>
    %117 = arith.divf %115, %116 : vector<8x64xf32>
    %118 = vector.extract_strided_slice %117 {offsets = [0, 0], sizes = [8, 32], strides = [1, 1]} : vector<8x64xf32> to vector<8x32xf32>
    %119 = vector.extract_strided_slice %117 {offsets = [0, 32], sizes = [8, 32], strides = [1, 1]} : vector<8x64xf32> to vector<8x32xf32>
    %120 = vector.extract_strided_slice %108 {offsets = [0, 64], sizes = [8, 32], strides = [1, 1]} : vector<8x128xf32> to vector<8x32xf32>
    %121 = vector.extract_strided_slice %109 {offsets = [0, 64], sizes = [8, 32], strides = [1, 1]} : vector<8x128xf32> to vector<8x32xf32>
    %122 = arith.addf %121, %3 : vector<8x32xf32>
    %123 = arith.mulf %118, %122 : vector<8x32xf32>
    %124 = arith.addf %120, %123 : vector<8x32xf32>
    %125 = math.tanh %124 : vector<8x32xf32>
    %cst_25 = arith.constant 1.000000e+00 : f32
    %126 = vector.broadcast %cst_25 : f32 to vector<8x32xf32>
    %127 = arith.subf %126, %119 : vector<8x32xf32>
    %128 = arith.mulf %127, %125 : vector<8x32xf32>
    %129 = arith.mulf %119, %107 : vector<8x32xf32>
    %130 = arith.addf %128, %129 : vector<8x32xf32>
    %131 = vector.extract_strided_slice %14 {offsets = [40, 0], sizes = [8, 128], strides = [1, 1]} : vector<64x128xf32> to vector<8x128xf32>
    %cst_26 = arith.constant dense<0.000000e+00> : vector<8x128xf32>
    %132 = tpu.matmul %130, %1, %cst_26 {dimension_numbers = #tpu.dot_dimension_numbers<[1], [0], [0], [1], [0, 0, 1, 1], [], []>} : vector<8x32xf32>, vector<32x128xf32>, vector<8x128xf32> -> vector<8x128xf32>
    %133 = vector.extract_strided_slice %131 {offsets = [0, 0], sizes = [8, 64], strides = [1, 1]} : vector<8x128xf32> to vector<8x64xf32>
    %134 = vector.extract_strided_slice %132 {offsets = [0, 0], sizes = [8, 64], strides = [1, 1]} : vector<8x128xf32> to vector<8x64xf32>
    %135 = arith.addf %133, %134 : vector<8x64xf32>
    %136 = arith.negf %135 : vector<8x64xf32>
    %137 = math.exp %136 : vector<8x64xf32>
    %cst_27 = arith.constant 1.000000e+00 : f32
    %138 = vector.broadcast %cst_27 : f32 to vector<8x64xf32>
    %139 = arith.addf %138, %137 : vector<8x64xf32>
    %140 = arith.divf %138, %139 : vector<8x64xf32>
    %141 = vector.extract_strided_slice %140 {offsets = [0, 0], sizes = [8, 32], strides = [1, 1]} : vector<8x64xf32> to vector<8x32xf32>
    %142 = vector.extract_strided_slice %140 {offsets = [0, 32], sizes = [8, 32], strides = [1, 1]} : vector<8x64xf32> to vector<8x32xf32>
    %143 = vector.extract_strided_slice %131 {offsets = [0, 64], sizes = [8, 32], strides = [1, 1]} : vector<8x128xf32> to vector<8x32xf32>
    %144 = vector.extract_strided_slice %132 {offsets = [0, 64], sizes = [8, 32], strides = [1, 1]} : vector<8x128xf32> to vector<8x32xf32>
    %145 = arith.addf %144, %3 : vector<8x32xf32>
    %146 = arith.mulf %141, %145 : vector<8x32xf32>
    %147 = arith.addf %143, %146 : vector<8x32xf32>
    %148 = math.tanh %147 : vector<8x32xf32>
    %cst_28 = arith.constant 1.000000e+00 : f32
    %149 = vector.broadcast %cst_28 : f32 to vector<8x32xf32>
    %150 = arith.subf %149, %142 : vector<8x32xf32>
    %151 = arith.mulf %150, %148 : vector<8x32xf32>
    %152 = arith.mulf %142, %130 : vector<8x32xf32>
    %153 = arith.addf %151, %152 : vector<8x32xf32>
    %154 = vector.extract_strided_slice %14 {offsets = [48, 0], sizes = [8, 128], strides = [1, 1]} : vector<64x128xf32> to vector<8x128xf32>
    %cst_29 = arith.constant dense<0.000000e+00> : vector<8x128xf32>
    %155 = tpu.matmul %153, %1, %cst_29 {dimension_numbers = #tpu.dot_dimension_numbers<[1], [0], [0], [1], [0, 0, 1, 1], [], []>} : vector<8x32xf32>, vector<32x128xf32>, vector<8x128xf32> -> vector<8x128xf32>
    %156 = vector.extract_strided_slice %154 {offsets = [0, 0], sizes = [8, 64], strides = [1, 1]} : vector<8x128xf32> to vector<8x64xf32>
    %157 = vector.extract_strided_slice %155 {offsets = [0, 0], sizes = [8, 64], strides = [1, 1]} : vector<8x128xf32> to vector<8x64xf32>
    %158 = arith.addf %156, %157 : vector<8x64xf32>
    %159 = arith.negf %158 : vector<8x64xf32>
    %160 = math.exp %159 : vector<8x64xf32>
    %cst_30 = arith.constant 1.000000e+00 : f32
    %161 = vector.broadcast %cst_30 : f32 to vector<8x64xf32>
    %162 = arith.addf %161, %160 : vector<8x64xf32>
    %163 = arith.divf %161, %162 : vector<8x64xf32>
    %164 = vector.extract_strided_slice %163 {offsets = [0, 0], sizes = [8, 32], strides = [1, 1]} : vector<8x64xf32> to vector<8x32xf32>
    %165 = vector.extract_strided_slice %163 {offsets = [0, 32], sizes = [8, 32], strides = [1, 1]} : vector<8x64xf32> to vector<8x32xf32>
    %166 = vector.extract_strided_slice %154 {offsets = [0, 64], sizes = [8, 32], strides = [1, 1]} : vector<8x128xf32> to vector<8x32xf32>
    %167 = vector.extract_strided_slice %155 {offsets = [0, 64], sizes = [8, 32], strides = [1, 1]} : vector<8x128xf32> to vector<8x32xf32>
    %168 = arith.addf %167, %3 : vector<8x32xf32>
    %169 = arith.mulf %164, %168 : vector<8x32xf32>
    %170 = arith.addf %166, %169 : vector<8x32xf32>
    %171 = math.tanh %170 : vector<8x32xf32>
    %cst_31 = arith.constant 1.000000e+00 : f32
    %172 = vector.broadcast %cst_31 : f32 to vector<8x32xf32>
    %173 = arith.subf %172, %165 : vector<8x32xf32>
    %174 = arith.mulf %173, %171 : vector<8x32xf32>
    %175 = arith.mulf %165, %153 : vector<8x32xf32>
    %176 = arith.addf %174, %175 : vector<8x32xf32>
    %177 = vector.extract_strided_slice %14 {offsets = [56, 0], sizes = [8, 128], strides = [1, 1]} : vector<64x128xf32> to vector<8x128xf32>
    %cst_32 = arith.constant dense<0.000000e+00> : vector<8x128xf32>
    %178 = tpu.matmul %176, %1, %cst_32 {dimension_numbers = #tpu.dot_dimension_numbers<[1], [0], [0], [1], [0, 0, 1, 1], [], []>} : vector<8x32xf32>, vector<32x128xf32>, vector<8x128xf32> -> vector<8x128xf32>
    %179 = vector.extract_strided_slice %177 {offsets = [0, 0], sizes = [8, 64], strides = [1, 1]} : vector<8x128xf32> to vector<8x64xf32>
    %180 = vector.extract_strided_slice %178 {offsets = [0, 0], sizes = [8, 64], strides = [1, 1]} : vector<8x128xf32> to vector<8x64xf32>
    %181 = arith.addf %179, %180 : vector<8x64xf32>
    %182 = arith.negf %181 : vector<8x64xf32>
    %183 = math.exp %182 : vector<8x64xf32>
    %cst_33 = arith.constant 1.000000e+00 : f32
    %184 = vector.broadcast %cst_33 : f32 to vector<8x64xf32>
    %185 = arith.addf %184, %183 : vector<8x64xf32>
    %186 = arith.divf %184, %185 : vector<8x64xf32>
    %187 = vector.extract_strided_slice %186 {offsets = [0, 0], sizes = [8, 32], strides = [1, 1]} : vector<8x64xf32> to vector<8x32xf32>
    %188 = vector.extract_strided_slice %186 {offsets = [0, 32], sizes = [8, 32], strides = [1, 1]} : vector<8x64xf32> to vector<8x32xf32>
    %189 = vector.extract_strided_slice %177 {offsets = [0, 64], sizes = [8, 32], strides = [1, 1]} : vector<8x128xf32> to vector<8x32xf32>
    %190 = vector.extract_strided_slice %178 {offsets = [0, 64], sizes = [8, 32], strides = [1, 1]} : vector<8x128xf32> to vector<8x32xf32>
    %191 = arith.addf %190, %3 : vector<8x32xf32>
    %192 = arith.mulf %187, %191 : vector<8x32xf32>
    %193 = arith.addf %189, %192 : vector<8x32xf32>
    %194 = math.tanh %193 : vector<8x32xf32>
    %cst_34 = arith.constant 1.000000e+00 : f32
    %195 = vector.broadcast %cst_34 : f32 to vector<8x32xf32>
    %196 = arith.subf %195, %188 : vector<8x32xf32>
    %197 = arith.mulf %196, %194 : vector<8x32xf32>
    %198 = arith.mulf %188, %176 : vector<8x32xf32>
    %199 = arith.addf %197, %198 : vector<8x32xf32>
    %cst_35 = arith.constant dense<0.000000e+00> : vector<8x32xf32>
    %200 = tpu.matmul %199, %6, %cst_35 {dimension_numbers = #tpu.dot_dimension_numbers<[1], [0], [0], [1], [0, 0, 1, 1], [], []>} : vector<8x32xf32>, vector<32x32xf32>, vector<8x32xf32> -> vector<8x32xf32>
    %201 = arith.addf %200, %4 : vector<8x32xf32>
    %cst_36 = arith.constant 0.000000e+00 : f32
    %202 = vector.broadcast %cst_36 : f32 to vector<8x32xf32>
    %203 = arith.maximumf %201, %202 : vector<8x32xf32>
    %cst_37 = arith.constant dense<0.000000e+00> : vector<8x128xf32>
    %204 = tpu.matmul %203, %2, %cst_37 {dimension_numbers = #tpu.dot_dimension_numbers<[1], [0], [0], [1], [0, 0, 1, 1], [], []>} : vector<8x32xf32>, vector<32x128xf32>, vector<8x128xf32> -> vector<8x128xf32>
    %205 = arith.addf %204, %5 : vector<8x128xf32>
    %c0_38 = arith.constant 0 : index
    %c0_39 = arith.constant 0 : index
    %206 = vector.load %arg2[%c0_38, %c0_39] : memref<8x128xf32, #tpu.memory_space<vmem>>, vector<8x128xf32>
    tpu.vector_store %arg2[%c0_38, %c0_39], %205 {strides = array<i32>} : memref<8x128xf32, #tpu.memory_space<vmem>>, vector<8x128xf32>,
    return
  }
}

</mosaic_0001>

<bundles_post_ra>
// kernel: discriminative_forward.1
= control target key start
LH: loop header
LB: loop body
LE: loop exit
PB: predicated region body
PF: predicated region fallthrough
CT: control target
= control target key end

     0   :  { %7 = vsyncpa [#allocation3], 0  ;;  %s1577_s9 = smov [#allocation2]   ;;  %s1812_s0 = inlined_call_operand.vmem [shape: s32[64,1], index: 0, kind: input, shape index: {}]   ;;  %s1813_s1 = inlined_call_operand.hbm [shape: f32[104,128], index: 1, kind: input, shape index: {}]   ;;  %s1814_s2 = inlined_call_operand.vmem [shape: f32[8,128], index: 2, kind: output, shape index: {}]  }
   0x1   :  { %s15_s10 = sshll.u32 %s1577_s9, 4  ;;  %s1553_s13 = scalar_lea.hbm %s1813_s1, 1664  ;;  %s16_s10 = int_to_ptr.vmem [resolvable:$true] %s15_s10 }
   0x2   :  { %p1554_p0 = scmp.ne.s32.totalorder %s1813_s1, %s1553_s13  ;;  %p1557_p1 = scmp.lt.u32.totalorder %s1553_s13, %s1813_s1 }
   0x4   :  { %p1559_p2 = pnand %p1557_p1, %p1554_p0 }
   0x6   :  { %1562 = shalt.err (!%p1559_p2)
}
   0x7   :  { %s1563_s18 = scalar_lea.vmem %s16_s10, 1664  ;;  %p1568_p4 = scmp.lt.s32.totalorder %s16_s10, %s16_s10 }
   0x8   :  { %p1564_p3 = scmp.ne.s32.totalorder %s16_s10, %s1563_s18  ;;  %p1569_p5 = scmp.lt.s32.totalorder %s1563_s18, %s1563_s18 }
   0xa   :  { %p1570_p6 = por %p1569_p5, %p1568_p4 }
   0xc   :  { %p1571_p7 = pnand %p1570_p6, %p1564_p3 }
   0xe   :  { %1574 = shalt.err (!%p1571_p7)
}
   0xf   :  { %s1578_s19 = smov 128   ;;  %s1579_s20 = smov 8  }
  0x10   :  { %21 = dma.hbm_to_vmem [thread:$0]  %s1813_s1, 1664, %s16_s10, [#allocation3], %s1578_s19, %s1578_s19, %s1579_s20  }
  0x11   :  { %1575 = dma.done.wait [#allocation3], 1664  }
  0x12   :  { %1576 = vsyncadd [#allocation3], 4294965632  ;;  %v1580_v0 = vmov 0   ;;  %v1581_v1 = vmov 0.0|0.0   ;;  %vm1582_vm0 = vmmov 0   ;;  %v1583_v2 = vmov 0.0  }
  0x13   :  { %1493 = vset.pattern.permute.xlu0 %v1580_v0  ;;  %1423 = vmatprep.subr.bf16.mxu1 %v1581_v1  ;;  %v38_v3 = vld [vmem:[%s1812_s0] sm:$0xff]  ;;  %v1620_v4 = vld [vmem:[#allocation2 + $0x10] sm:$0xff]  ;;  %v1622_v5 = vld [vmem:[#allocation2 + $0x18] sm:$0xff]  ;;  %s1584_s26 = smov 64   ;;  %v46_v15 = vlaneseq  ;;  %vm88_vm1 = vcmask 130048   ;;  %s1585_s27 = smov 96  }
  0x14   :  { %1317 = vmatprep.mubr.msk.f32.mxu1 %vm1582_vm0, %v1583_v2  ;;  %1494 = vset.pattern.permute.xlu1 %v1580_v0  ;;  %v1624_v6 = vld [vmem:[#allocation2 + $0x20] sm:$0xff]  ;;  %v1626_v7 = vld [vmem:[#allocation2 + $0x28] sm:$0xff]  ;;  %v1633_v9 = vpack.c.bf16 %v1622_v5, %v1620_v4  ;;  %v35_v14 = vld [vmem:[#allocation2 + $0x50] sm:$0xff]  ;;  %vm218_vm4 = vcmask 261120  }
  0x15   :  { %49 = vperm.xlu0 %1493, %v38_v3   ;;  %v39_v8 = vld [vmem:[%s1812_s0 + $0x8] sm:$0xff]  ;;  %v25_v10 = vld [vmem:[#allocation2] sm:$0xff]  ;;  %v1638_v13 = vpack.c.bf16 %v1626_v7, %v1624_v6  ;;  %300 = vrot.lane.b32.xlu1 %v35_v14, %s1584_s26  ;;  %v1652_v16 = vand.u32 127, %v46_v15  ;;  %v40_v53 = vld [vmem:[%s1812_s0 + $0x10] sm:$0xff] }
  0x16   :  { %v26_v11 = vld [vmem:[#allocation2 + $0x8] sm:$0xff]  ;;  %1425 = vmatpush3.bf16.msra.mxu1 %v1633_v9  ;;  %v42_v54 = vld [vmem:[%s1812_s0 + $0x20] sm:$0xff]  ;;  %v44_v55 = vld [vmem:[%s1812_s0 + $0x30] sm:$0xff] }
  0x17   :  { %v1419_v12 = vpack.c.bf16 %v26_v11, %v25_v10  ;;  %1426 = vmatprep.subr.bf16.mxu1 %v1581_v1  ;;  %v41_v59 = vld [vmem:[%s1812_s0 + $0x18] sm:$0xff]  ;;  %v43_v62 = vld [vmem:[%s1812_s0 + $0x28] sm:$0xff] }
  0x18   :  { %v45_v63 = vld [vmem:[%s1812_s0 + $0x38] sm:$0xff]  ;;  %s1586_s0 = smov 32  }
  0x19   :  { %52 = vperm.xlu0 %1493, %v39_v8   ;;  %1420 = vmatprep.subr.bf16.mxu0 %v1419_v12 }
  0x1a   :  { %1422 = vmatpush3.bf16.msra.mxu0 %v1419_v12  ;;  %1428 = vmatpush3.bf16.msra.mxu1 %v1638_v13 }
  0x1b   :  { %1429 = vmatprep.subr.bf16.mxu1 %v1581_v1  ;;  %1435 = vmatprep.subr.bf16.mxu0 %v1581_v1 }
  0x1d   :  { %1318 = vmatmul.mubr.f32.vlgmr.msra.gmra.mrb[0].mxu1 %v1583_v2 }
  0x1e   :  { %1431 = vmatpush3.bf16.msra.mxu1 %v1633_v9  ;;  %1328 = vmatprep.mubr.msk.f32.mxu1 %vm1582_vm0, %v1583_v2 }
  0x1f   :  { %1432 = vmatprep.subr.bf16.mxu1 %v1581_v1 }
  0x22   :  { %1434 = vmatpush3.bf16.msra.mxu1 %v1638_v13 }
  0x23   :  { %1441 = vmatprep.subr.bf16.mxu1 %v1581_v1 }
  0x87   :  { %v1664_v21 = vpop.permute.xlu1 %300 }
  0x94   :  { %v50_v17 = vpop.permute.xlu0 %49 }
  0x95   :  { %vm72_vm2 = vcmp.eq.s32.totalorder %v50_v17, %v1652_v16 }
  0x96   :  { %v80_v18 = vsel %vm72_vm2, 1.0, %v1583_v2 }
  0x97   :  { %1297 = vmatprep.mubr.msk.f32.mxu0 %vm88_vm1, %v80_v18 }
  0x98   :  { %v53_v19 = vpop.permute.xlu0 %52 }
  0x99   :  { %vm73_vm3 = vcmp.eq.s32.totalorder %v53_v19, %v1652_v16 }
  0x9a   :  { %v81_v20 = vsel %vm73_vm3, 1.0, %v1583_v2 }
  0x9b   :  { %1298 = vmatmul.mubr.msk.f32.vlgmr.msra.gmra.mrb[0].mxu0 %vm88_vm1, %v81_v20 }
  0x9c   :  { %1437 = vmatpush3.bf16.msra.mxu0 %v1633_v9 }
  0x9d   :  { %1438 = vmatprep.subr.bf16.mxu0 %v1581_v1 }
  0xa0   :  { %1440 = vmatpush3.bf16.msra.mxu0 %v1638_v13 }
  0xa1   :  { %1447 = vmatprep.subr.bf16.mxu0 %v1581_v1 }
  0xf0   :  { %v288_v22 = vpop.f32.mrb[0].mxu1 }
  0xf1   :  { %v1319_v23 = vpop.f32.mrb[1].mxu1  ;;  %v303_v24 = vadd.f32 %v1664_v21, %v288_v22 }
  0xf3   :  { %305 = vrot.lane.b32.xlu1 %v303_v24, %s1584_s26 }
 0x165   :  { %v306_v31 = vpop.permute.xlu1 %305 }
 0x16e   :  { %v1299_v25 = vpop.f32.mrb[0].mxu0 }
 0x16f   :  { %v179_v26 = vpop.f32.mrb[1].mxu0 }
 0x170   :  { %v292_v27 = vadd.f32 %v288_v22, %v179_v26 }
 0x172   :  { %v1216_v28 = vmul.f32 -1.442695, %v292_v27 }
 0x174   :  { %1505 = vpow2.f32 %v1216_v28 }
 0x17e   :  { %v1506_v29 = vpop.eup %1505 }
 0x17f   :  { %v296_v30 = vadd.f32 1.0, %v1506_v29 }
 0x181   :  { %1507 = vrcp.f32 %v296_v30 }
 0x18b   :  { %v1508_v32 = vpop.eup %1507 }
 0x18c   :  { %v308_v33 = vmul.f32 %v1508_v32, %v306_v31  ;;  %v315_v37 = vsub.f32 1.0, %v1508_v32  ;;  %v321_v39 = vmul.f32 0.0, %v1508_v32 }
 0x18e   :  { %310 = vrot.lane.b32.xlu0 %v308_v33, %s1584_s26 }
 0x200   :  { %v311_v34 = vpop.permute.xlu0 %310 }
 0x201   :  { %v313_v35 = vadd.f32 %v311_v34, %v179_v26 }
 0x203   :  { %1509 = vtanh.f32 %v313_v35 }
 0x20d   :  { %v1510_v36 = vpop.eup %1509 }
 0x20e   :  { %317 = vrot.lane.b32.xlu1 %v1510_v36, %s1585_s27 }
 0x280   :  { %v318_v38 = vpop.permute.xlu1 %317 }
 0x281   :  { %v320_v40 = vmul.f32 %v318_v38, %v315_v37 }
 0x283   :  { %v322_v41 = vadd.f32 %v321_v39, %v320_v40 }
 0x285   :  { %324 = vrot.lane.b32.xlu0 %v322_v41, %s1585_s27 }
 0x2f7   :  { %v325_v42 = vpop.permute.xlu0 %324 }
 0x2f8   :  { %1329 = vmatmul.mubr.msk.f32.vlgmr.msra.gmra.mrb[2].mxu1 %vm218_vm4, %v325_v42 }
 0x2f9   :  { %1443 = vmatpush3.bf16.msra.mxu1 %v1633_v9  ;;  %1350 = vmatprep.mubr.msk.f32.mxu1 %vm1582_vm0, %v1583_v2 }
 0x2fa   :  { %1444 = vmatprep.subr.bf16.mxu1 %v1581_v1 }
 0x2fd   :  { %1446 = vmatpush3.bf16.msra.mxu1 %v1638_v13 }
 0x2fe   :  { %1453 = vmatprep.subr.bf16.mxu1 %v1581_v1 }
 0x3cb   :  { %v394_v43 = vpop.f32.mrb[2].mxu1 }
 0x3cc   :  { %v398_v44 = vadd.f32 %v1299_v25, %v394_v43  ;;  %v405_v45 = vadd.f32 %v394_v43, %v1664_v21  ;;  %v1330_v46 = vpop.f32.mrb[3].mxu1 }
 0x3ce   :  { %407 = vrot.lane.b32.xlu1 %v405_v45, %s1584_s26  ;;  %v1218_v47 = vmul.f32 -1.442695, %v398_v44 }
 0x3d0   :  { %1511 = vpow2.f32 %v1218_v47 }
 0x3da   :  { %v1512_v48 = vpop.eup %1511 }
 0x3db   :  { %v402_v49 = vadd.f32 1.0, %v1512_v48 }
 0x3dd   :  { %1513 = vrcp.f32 %v402_v49 }
 0x3e7   :  { %v1514_v50 = vpop.eup %1513 }
 0x3e8   :  { %v417_v0 = vsub.f32 1.0, %v1514_v50  ;;  %v423_v8 = vmul.f32 %v1514_v50, %v322_v41 }
 0x440   :  { %v408_v51 = vpop.permute.xlu1 %407 }
 0x441   :  { %v410_v52 = vmul.f32 %v1514_v50, %v408_v51 }
 0x443   :  { %412 = vrot.lane.b32.xlu0 %v410_v52, %s1584_s26 }
 0x447   :  { %55 = vperm.xlu0 %1493, %v40_v53  }
 0x44b   :  { %61 = vperm.xlu0 %1493, %v42_v54  }
 0x44f   :  { %67 = vperm.xlu0 %1493, %v44_v55  }
 0x4b5   :  { %v413_v56 = vpop.permute.xlu0 %412 }
 0x4b6   :  { %v415_v57 = vadd.f32 %v1299_v25, %v413_v56 }
 0x4b8   :  { %1515 = vtanh.f32 %v415_v57 }
 0x4c2   :  { %v1516_v58 = vpop.eup %1515 }
 0x4c3   :  { %419 = vrot.lane.b32.xlu1 %v1516_v58, %s1585_s27 }
 0x4c6   :  { %v56_v60 = vpop.permute.xlu0 %55 }
 0x4c7   :  { %vm74_vm5 = vcmp.eq.s32.totalorder %v56_v60, %v1652_v16  ;;  %58 = vperm.xlu1 %1494, %v41_v59  }
 0x4c8   :  { %v82_v61 = vsel %vm74_vm5, 1.0, %v1583_v2 }
 0x4c9   :  { %1300 = vmatprep.mubr.msk.f32.mxu0 %vm88_vm1, %v82_v61 }
 0x4ca   :  { %v62_v12 = vpop.permute.xlu0 %61 }
 0x4cb   :  { %64 = vperm.xlu1 %1494, %v43_v62   ;;  %vm76_vm6 = vcmp.eq.s32.totalorder %v62_v12, %v1652_v16 }
 0x4cc   :  { %v84_v18 = vsel %vm76_vm6, 1.0, %v1583_v2 }
 0x4ce   :  { %v68_v15 = vpop.permute.xlu0 %67 }
 0x4cf   :  { %70 = vperm.xlu1 %1494, %v45_v63   ;;  %vm78_vm8 = vcmp.eq.s32.totalorder %v68_v15, %v1652_v16 }
 0x4d0   :  { %v86_v22 = vsel %vm78_vm8, 1.0, %v1583_v2 }
 0x535   :  { %v420_v3 = vpop.permute.xlu1 %419 }
 0x536   :  { %v422_v10 = vmul.f32 %v420_v3, %v417_v0 }
 0x538   :  { %v424_v11 = vadd.f32 %v423_v8, %v422_v10 }
 0x53a   :  { %426 = vrot.lane.b32.xlu0 %v424_v11, %s1585_s27 }
 0x546   :  { %v59_v14 = vpop.permute.xlu1 %58 }
 0x547   :  { %vm75_vm7 = vcmp.eq.s32.totalorder %v59_v14, %v1652_v16 }
 0x548   :  { %v83_v17 = vsel %vm75_vm7, 1.0, %v1583_v2 }
 0x549   :  { %1301 = vmatmul.mubr.msk.f32.gmra.mrb[2].mxu0 %vm88_vm1, %v83_v17 }
 0x54a   :  { %v65_v19 = vpop.permute.xlu1 %64  ;;  %1303 = vmatprep.mubr.msk.f32.mxu0 %vm88_vm1, %v84_v18 }
 0x54b   :  { %vm77_vm9 = vcmp.eq.s32.totalorder %v65_v19, %v1652_v16 }
 0x54c   :  { %v85_v20 = vsel %vm77_vm9, 1.0, %v1583_v2 }
 0x54d   :  { %1304 = vmatmul.mubr.msk.f32.gmra.mrb[4].mxu0 %vm88_vm1, %v85_v20 }
 0x54e   :  { %1306 = vmatprep.mubr.msk.f32.mxu0 %vm88_vm1, %v86_v22  ;;  %v71_v23 = vpop.permute.xlu1 %70 }
 0x54f   :  { %vm79_vm10 = vcmp.eq.s32.totalorder %v71_v23, %v1652_v16 }
 0x550   :  { %v87_v24 = vsel %vm79_vm10, 1.0, %v1583_v2 }
 0x551   :  { %1307 = vmatmul.mubr.msk.f32.gmra.mrb[6].mxu0 %vm88_vm1, %v87_v24 }
 0x552   :  { %1339 = vmatprep.mubr.msk.f32.mxu0 %vm1582_vm0, %v1583_v2 }
 0x5ac   :  { %v427_v25 = vpop.permute.xlu0 %426 }
 0x5ad   :  { %1340 = vmatmul.mubr.msk.f32.vlgmr.msra.gmra.mrb[8].mxu0 %vm218_vm4, %v427_v25 }
 0x5ae   :  { %1449 = vmatpush3.bf16.msra.mxu0 %v1633_v9  ;;  %1361 = vmatprep.mubr.msk.f32.mxu0 %vm1582_vm0, %v1583_v2 }
 0x5af   :  { %1450 = vmatprep.subr.bf16.mxu0 %v1581_v1 }
 0x5b2   :  { %1452 = vmatpush3.bf16.msra.mxu0 %v1638_v13 }
 0x5b3   :  { %1459 = vmatprep.subr.bf16.mxu0 %v1581_v1 }
 0x61c   :  { %v1302_v16 = vpop.f32.mrb[2].mxu0 }
 0x61d   :  { %v189_v26 = vpop.f32.mrb[3].mxu0 }
 0x620   :  { %v1728_v27 = vpop.f32.mrb[4].mxu0 }
 0x621   :  { %v1730_v28 = vpop.f32.mrb[5].mxu0 }
 0x624   :  { %v1732_v29 = vpop.f32.mrb[6].mxu0 }
 0x625   :  { %v1734_v30 = vpop.f32.mrb[7].mxu0 }
 0x680   :  { %v496_v31 = vpop.f32.mrb[8].mxu0 }
 0x681   :  { %v500_v32 = vadd.f32 %v496_v31, %v189_v26  ;;  %v507_v33 = vadd.f32 %v496_v31, %v1664_v21  ;;  %v1341_v34 = vpop.f32.mrb[9].mxu0 }
 0x683   :  { %509 = vrot.lane.b32.xlu1 %v507_v33, %s1584_s26  ;;  %v1220_v35 = vmul.f32 -1.442695, %v500_v32 }
 0x685   :  { %1517 = vpow2.f32 %v1220_v35 }
 0x68f   :  { %v1518_v36 = vpop.eup %1517 }
 0x690   :  { %v504_v37 = vadd.f32 1.0, %v1518_v36 }
 0x692   :  { %1519 = vrcp.f32 %v504_v37 }
 0x69c   :  { %v1520_v38 = vpop.eup %1519 }
 0x69d   :  { %v519_v44 = vsub.f32 1.0, %v1520_v38  ;;  %v525_v46 = vmul.f32 %v1520_v38, %v424_v11 }
 0x6f5   :  { %v510_v39 = vpop.permute.xlu1 %509 }
 0x6f6   :  { %v512_v40 = vmul.f32 %v1520_v38, %v510_v39 }
 0x6f8   :  { %514 = vrot.lane.b32.xlu0 %v512_v40, %s1584_s26 }
 0x76a   :  { %v515_v41 = vpop.permute.xlu0 %514 }
 0x76b   :  { %v517_v42 = vadd.f32 %v515_v41, %v189_v26 }
 0x76d   :  { %1521 = vtanh.f32 %v517_v42 }
 0x777   :  { %v1522_v43 = vpop.eup %1521 }
 0x778   :  { %521 = vrot.lane.b32.xlu1 %v1522_v43, %s1585_s27 }
 0x7ea   :  { %v522_v45 = vpop.permute.xlu1 %521 }
 0x7eb   :  { %v524_v47 = vmul.f32 %v522_v45, %v519_v44 }
 0x7ed   :  { %v526_v48 = vadd.f32 %v525_v46, %v524_v47 }
 0x7ef   :  { %528 = vrot.lane.b32.xlu0 %v526_v48, %s1585_s27 }
 0x861   :  { %v529_v49 = vpop.permute.xlu0 %528 }
 0x862   :  { %1351 = vmatmul.mubr.msk.f32.vlgmr.msra.gmra.mrb[4].mxu1 %vm218_vm4, %v529_v49 }
 0x863   :  { %1455 = vmatpush3.bf16.msra.mxu1 %v1633_v9  ;;  %1372 = vmatprep.mubr.msk.f32.mxu1 %vm1582_vm0, %v1583_v2 }
 0x864   :  { %1456 = vmatprep.subr.bf16.mxu1 %v1581_v1 }
 0x867   :  { %1458 = vmatpush3.bf16.msra.mxu1 %v1638_v13 }
 0x868   :  { %1465 = vmatprep.subr.bf16.mxu1 %v1581_v1 }
 0x935   :  { %v598_v50 = vpop.f32.mrb[4].mxu1 }
 0x936   :  { %v602_v51 = vadd.f32 %v1302_v16, %v598_v50  ;;  %v609_v52 = vadd.f32 %v598_v50, %v1664_v21  ;;  %v1352_v53 = vpop.f32.mrb[5].mxu1 }
 0x938   :  { %611 = vrot.lane.b32.xlu1 %v609_v52, %s1584_s26  ;;  %v1222_v54 = vmul.f32 -1.442695, %v602_v51 }
 0x93a   :  { %1523 = vpow2.f32 %v1222_v54 }
 0x944   :  { %v1524_v55 = vpop.eup %1523 }
 0x945   :  { %v606_v56 = vadd.f32 1.0, %v1524_v55 }
 0x947   :  { %1525 = vrcp.f32 %v606_v56 }
 0x951   :  { %v1526_v57 = vpop.eup %1525 }
 0x952   :  { %v621_v63 = vsub.f32 1.0, %v1526_v57  ;;  %v627_v3 = vmul.f32 %v1526_v57, %v526_v48 }
 0x9aa   :  { %v612_v58 = vpop.permute.xlu1 %611 }
 0x9ab   :  { %v614_v59 = vmul.f32 %v1526_v57, %v612_v58 }
 0x9ad   :  { %616 = vrot.lane.b32.xlu0 %v614_v59, %s1584_s26 }
 0xa1f   :  { %v617_v60 = vpop.permute.xlu0 %616 }
 0xa20   :  { %v619_v61 = vadd.f32 %v1302_v16, %v617_v60 }
 0xa22   :  { %1527 = vtanh.f32 %v619_v61 }
 0xa2c   :  { %v1528_v62 = vpop.eup %1527 }
 0xa2d   :  { %623 = vrot.lane.b32.xlu1 %v1528_v62, %s1585_s27 }
 0xa9f   :  { %v624_v0 = vpop.permute.xlu1 %623 }
 0xaa0   :  { %v626_v8 = vmul.f32 %v624_v0, %v621_v63 }
 0xaa2   :  { %v628_v10 = vadd.f32 %v627_v3, %v626_v8 }
 0xaa4   :  { %630 = vrot.lane.b32.xlu0 %v628_v10, %s1585_s27 }
 0xb16   :  { %v631_v11 = vpop.permute.xlu0 %630 }
 0xb17   :  { %1362 = vmatmul.mubr.msk.f32.vlgmr.msra.gmra.mrb[10].mxu0 %vm218_vm4, %v631_v11 }
 0xb18   :  { %1461 = vmatpush3.bf16.msra.mxu0 %v1633_v9  ;;  %1383 = vmatprep.mubr.msk.f32.mxu0 %vm1582_vm0, %v1583_v2 }
 0xb19   :  { %1462 = vmatprep.subr.bf16.mxu0 %v1581_v1 }
 0xb1c   :  { %1464 = vmatpush3.bf16.msra.mxu0 %v1638_v13 }
 0xb1d   :  { %1471 = vmatprep.subr.bf16.mxu0 %v1581_v1 }
 0xbea   :  { %v700_v12 = vpop.f32.mrb[10].mxu0 }
 0xbeb   :  { %v704_v14 = vadd.f32 %v700_v12, %v1730_v28  ;;  %v711_v15 = vadd.f32 %v700_v12, %v1664_v21  ;;  %v1363_v17 = vpop.f32.mrb[11].mxu0 }
 0xbed   :  { %713 = vrot.lane.b32.xlu1 %v711_v15, %s1584_s26  ;;  %v1224_v18 = vmul.f32 -1.442695, %v704_v14 }
 0xbef   :  { %1529 = vpow2.f32 %v1224_v18 }
 0xbf9   :  { %v1530_v19 = vpop.eup %1529 }
 0xbfa   :  { %v708_v20 = vadd.f32 1.0, %v1530_v19 }
 0xbfc   :  { %1531 = vrcp.f32 %v708_v20 }
 0xc06   :  { %v1532_v22 = vpop.eup %1531 }
 0xc07   :  { %v723_v31 = vsub.f32 1.0, %v1532_v22  ;;  %v729_v33 = vmul.f32 %v1532_v22, %v628_v10 }
 0xc5f   :  { %v714_v23 = vpop.permute.xlu1 %713 }
 0xc60   :  { %v716_v24 = vmul.f32 %v1532_v22, %v714_v23 }
 0xc62   :  { %718 = vrot.lane.b32.xlu0 %v716_v24, %s1584_s26 }
 0xcd4   :  { %v719_v25 = vpop.permute.xlu0 %718 }
 0xcd5   :  { %v721_v16 = vadd.f32 %v719_v25, %v1730_v28 }
 0xcd7   :  { %1533 = vtanh.f32 %v721_v16 }
 0xce1   :  { %v1534_v26 = vpop.eup %1533 }
 0xce2   :  { %725 = vrot.lane.b32.xlu1 %v1534_v26, %s1585_s27 }
 0xd54   :  { %v726_v32 = vpop.permute.xlu1 %725 }
 0xd55   :  { %v728_v34 = vmul.f32 %v726_v32, %v723_v31 }
 0xd57   :  { %v730_v35 = vadd.f32 %v729_v33, %v728_v34 }
 0xd59   :  { %732 = vrot.lane.b32.xlu0 %v730_v35, %s1585_s27 }
 0xdcb   :  { %v733_v36 = vpop.permute.xlu0 %732 }
 0xdcc   :  { %1373 = vmatmul.mubr.msk.f32.vlgmr.msra.gmra.mrb[6].mxu1 %vm218_vm4, %v733_v36 }
 0xdcd   :  { %1467 = vmatpush3.bf16.msra.mxu1 %v1633_v9  ;;  %1394 = vmatprep.mubr.msk.f32.mxu1 %vm1582_vm0, %v1583_v2 }
 0xdce   :  { %1468 = vmatprep.subr.bf16.mxu1 %v1581_v1 }
 0xdd1   :  { %1470 = vmatpush3.bf16.msra.mxu1 %v1638_v13 }
 0xdd2   :  { %1477 = vmatprep.subr.bf16.mxu1 %v1581_v1 }
 0xe9f   :  { %v802_v28 = vpop.f32.mrb[6].mxu1 }
 0xea0   :  { %v806_v37 = vadd.f32 %v1728_v27, %v802_v28  ;;  %v813_v38 = vadd.f32 %v802_v28, %v1664_v21  ;;  %v1374_v39 = vpop.f32.mrb[7].mxu1 }
 0xea2   :  { %815 = vrot.lane.b32.xlu1 %v813_v38, %s1584_s26  ;;  %v1226_v40 = vmul.f32 -1.442695, %v806_v37 }
 0xea4   :  { %1535 = vpow2.f32 %v1226_v40 }
 0xeae   :  { %v1536_v9 = vpop.eup %1535 }
 0xeaf   :  { %v810_v41 = vadd.f32 1.0, %v1536_v9 }
 0xeb1   :  { %1537 = vrcp.f32 %v810_v41 }
 0xebb   :  { %v1538_v42 = vpop.eup %1537 }
 0xebc   :  { %v825_v47 = vsub.f32 1.0, %v1538_v42  ;;  %v831_v49 = vmul.f32 %v1538_v42, %v730_v35  ;;  %v1500_v35 = vpack.i.bf16 %v1626_v7, %v1624_v6  ;;  %v33_v7 = vld [vmem:[#allocation2 + $0x40] sm:$0xff] }
 0xf14   :  { %v816_v43 = vpop.permute.xlu1 %815 }
 0xf15   :  { %v818_v44 = vmul.f32 %v1538_v42, %v816_v43  ;;  %v34_v43 = vld [vmem:[#allocation2 + $0x48] sm:$0xff] }
 0xf17   :  { %820 = vrot.lane.b32.xlu0 %v818_v44, %s1584_s26  ;;  %v1481_v44 = vpack.c.bf16 %v34_v43, %v33_v7 }
 0xf89   :  { %v821_v13 = vpop.permute.xlu0 %820 }
 0xf8a   :  { %v823_v45 = vadd.f32 %v1728_v27, %v821_v13 }
 0xf8c   :  { %1539 = vtanh.f32 %v823_v45 }
 0xf96   :  { %v1540_v46 = vpop.eup %1539 }
 0xf97   :  { %827 = vrot.lane.b32.xlu1 %v1540_v46, %s1585_s27 }
0x1009   :  { %v828_v48 = vpop.permute.xlu1 %827 }
0x100a   :  { %v830_v50 = vmul.f32 %v828_v48, %v825_v47  ;;  %v37_v48 = vld [vmem:[#allocation2 + $0x60] sm:$0xff] }
0x100c   :  { %v832_v51 = vadd.f32 %v831_v49, %v830_v50 }
0x100e   :  { %834 = vrot.lane.b32.xlu0 %v832_v51, %s1585_s27 }
0x1080   :  { %v835_v52 = vpop.permute.xlu0 %834 }
0x1081   :  { %1384 = vmatmul.mubr.msk.f32.vlgmr.msra.gmra.mrb[12].mxu0 %vm218_vm4, %v835_v52 }
0x1082   :  { %1405 = vmatprep.mubr.msk.f32.mxu0 %vm1582_vm0, %v1583_v2 }
0x1154   :  { %v904_v53 = vpop.f32.mrb[12].mxu0 }
0x1155   :  { %v908_v27 = vadd.f32 %v904_v53, %v1734_v30  ;;  %v915_v54 = vadd.f32 %v904_v53, %v1664_v21  ;;  %v1385_v55 = vpop.f32.mrb[13].mxu0 }
0x1157   :  { %917 = vrot.lane.b32.xlu1 %v915_v54, %s1584_s26  ;;  %v1228_v56 = vmul.f32 -1.442695, %v908_v27 }
0x1159   :  { %1541 = vpow2.f32 %v1228_v56 }
0x1163   :  { %v1542_v57 = vpop.eup %1541 }
0x1164   :  { %v912_v58 = vadd.f32 1.0, %v1542_v57 }
0x1166   :  { %1543 = vrcp.f32 %v912_v58 }
0x1170   :  { %v1544_v59 = vpop.eup %1543 }
0x1171   :  { %v927_v3 = vsub.f32 1.0, %v1544_v59  ;;  %v933_v10 = vmul.f32 %v1544_v59, %v832_v51 }
0x11c9   :  { %v918_v60 = vpop.permute.xlu1 %917 }
0x11ca   :  { %v920_v61 = vmul.f32 %v1544_v59, %v918_v60 }
0x11cc   :  { %922 = vrot.lane.b32.xlu0 %v920_v61, %s1584_s26 }
0x123e   :  { %v923_v62 = vpop.permute.xlu0 %922 }
0x123f   :  { %v925_v63 = vadd.f32 %v923_v62, %v1734_v30 }
0x1241   :  { %1545 = vtanh.f32 %v925_v63 }
0x124b   :  { %v1546_v0 = vpop.eup %1545 }
0x124c   :  { %929 = vrot.lane.b32.xlu1 %v1546_v0, %s1585_s27 }
0x12be   :  { %v930_v8 = vpop.permute.xlu1 %929 }
0x12bf   :  { %v932_v11 = vmul.f32 %v930_v8, %v927_v3 }
0x12c1   :  { %v934_v12 = vadd.f32 %v933_v10, %v932_v11 }
0x12c3   :  { %936 = vrot.lane.b32.xlu0 %v934_v12, %s1585_s27 }
0x1335   :  { %v937_v14 = vpop.permute.xlu0 %936 }
0x1336   :  { %1395 = vmatmul.mubr.msk.f32.vlgmr.msra.gmra.mrb[8].mxu1 %vm218_vm4, %v937_v14 }
0x1337   :  { %1416 = vmatprep.mubr.msk.f32.mxu1 %vm1582_vm0, %v1583_v2  ;;  %v1495_v2 = vpack.i.bf16 %v1622_v5, %v1620_v4  ;;  %v31_v4 = vld [vmem:[#allocation2 + $0x30] sm:$0xff]  ;;  %v32_v5 = vld [vmem:[#allocation2 + $0x38] sm:$0xff] }
0x1338   :  { %v1478_v36 = vpack.c.bf16 %v32_v5, %v31_v4 }
0x133a   :  { %1479 = vmatpush3.bf16.msra.mxu1 %v1478_v36 }
0x133b   :  { %1480 = vmatprep.subr.bf16.mxu1 %v1581_v1 }
0x133e   :  { %1482 = vmatpush3.bf16.msra.mxu1 %v1481_v44 }
0x1409   :  { %v1006_v15 = vpop.f32.mrb[8].mxu1 }
0x140a   :  { %v1010_v30 = vadd.f32 %v1732_v29, %v1006_v15  ;;  %v1017_v17 = vadd.f32 %v1006_v15, %v1664_v21  ;;  %v1396_v18 = vpop.f32.mrb[9].mxu1 }
0x140c   :  { %1019 = vrot.lane.b32.xlu1 %v1017_v17, %s1584_s26  ;;  %v1230_v19 = vmul.f32 -1.442695, %v1010_v30 }
0x140e   :  { %1547 = vpow2.f32 %v1230_v19 }
0x1418   :  { %v1548_v20 = vpop.eup %1547 }
0x1419   :  { %v1014_v22 = vadd.f32 1.0, %v1548_v20 }
0x141b   :  { %1549 = vrcp.f32 %v1014_v22 }
0x1425   :  { %v1550_v23 = vpop.eup %1549 }
0x1426   :  { %v1035_v37 = vmul.f32 %v1550_v23, %v934_v12 }
0x147e   :  { %v1020_v24 = vpop.permute.xlu1 %1019 }
0x147f   :  { %v1022_v25 = vmul.f32 %v1550_v23, %v1020_v24 }
0x1481   :  { %1024 = vrot.lane.b32.xlu0 %v1022_v25, %s1584_s26 }
0x1485   :  { %1496 = vrot.lane.b32.xlu0 %v1495_v2, %s1586_s0 }
0x14f3   :  { %v1025_v16 = vpop.permute.xlu0 %1024 }
0x14f4   :  { %v1027_v21 = vadd.f32 %v1732_v29, %v1025_v16  ;;  %v1029_v29 = vsub.f32 1.0, %v1550_v23 }
0x14f6   :  { %1551 = vtanh.f32 %v1027_v21 }
0x14f7   :  { %v1497_v26 = vpop.permute.xlu0 %1496 }
0x14f8   :  { %v1499_v31 = vunpack.i.h.bf16 %v1497_v26  ;;  %v1498_v32 = vunpack.i.l.bf16 %v1497_v26 }
0x14fa   :  { %v1472_v33 = vpack.c.bf16 %v1499_v31, %v1498_v32 }
0x14fc   :  { %1473 = vmatpush3.bf16.msra.mxu0 %v1472_v33 }
0x14fd   :  { %1474 = vmatprep.subr.bf16.mxu0 %v1581_v1  ;;  %v36_v1 = vld [vmem:[#allocation2 + $0x58] sm:$0xff] }
0x1500   :  { %v1552_v34 = vpop.eup %1551 }
0x1501   :  { %1031 = vrot.lane.b32.xlu1 %v1552_v34, %s1585_s27 }
0x1505   :  { %1501 = vrot.lane.b32.xlu1 %v1500_v35, %s1586_s0 }
0x1573   :  { %v1032_v28 = vpop.permute.xlu1 %1031 }
0x1574   :  { %v1034_v38 = vmul.f32 %v1032_v28, %v1029_v29 }
0x1576   :  { %v1036_v39 = vadd.f32 %v1035_v37, %v1034_v38 }
0x1577   :  { %v1502_v40 = vpop.permute.xlu1 %1501 }
0x1578   :  { %1038 = vrot.lane.b32.xlu0 %v1036_v39, %s1585_s27  ;;  %v1504_v9 = vunpack.i.h.bf16 %v1502_v40  ;;  %v1503_v41 = vunpack.i.l.bf16 %v1502_v40 }
0x157a   :  { %v1475_v42 = vpack.c.bf16 %v1504_v9, %v1503_v41 }
0x157c   :  { %1476 = vmatpush3.bf16.msra.mxu0 %v1475_v42 }
0x15ea   :  { %v1039_v6 = vpop.permute.xlu0 %1038 }
0x15eb   :  { %1406 = vmatmul.mubr.msk.f32.vlgmr.msra.gmra.mrb[14].mxu0 %vm218_vm4, %v1039_v6 }
0x16be   :  { %v1124_v13 = vpop.f32.mrb[14].mxu0 }
0x16bf   :  { %v1125_v45 = vadd.f32 %v1124_v13, %v36_v1  ;;  %v1407_v46 = vpop.f32.mrb[15].mxu0 }
0x16c1   :  { %v1128_v47 = vmax.f32 %v1125_v45, 0.0 }
0x16c3   :  { %1417 = vmatmul.mubr.msk.f32.vlgmr.msra.gmra.mrb[10].mxu1 %vm218_vm4, %v1128_v47 }
0x1796   :  { %v1198_v49 = vpop.f32.mrb[10].mxu1 }
0x1797   :  { %v1199_v50 = vadd.f32 %v1198_v49, %v37_v48  ;;  %v1418_v51 = vpop.f32.mrb[11].mxu1 }
0x1799   :  { %1202 = vst [vmem:[%s1814_s2] sm:$0xff] %v1199_v50 }
0x179a   :  { %1207 = vsyncpa [#allocation3], 1 }

</bundles_post_ra>
